<compile_context>
chip_gen: v6e
topology: v6e:2x2x1
jax: 0.10.0
libtpu: 0.0.40
codegen_flags: <defaults>
</compile_context>

<pallas_src>
import functools

import jax
import jax.numpy as jnp
from jax.experimental import pallas as pl
from jax.experimental.pallas import tpu as pltpu


def rnn_kernel(x_ref, wih_t_ref, whh_t_ref, b_ref, y_ref, *, seq_len, batch_pad):
    """Single-invocation RNN.

    x_ref:     (T*B_pad, In)  time-major, batch padded to a multiple of 8
    wih_t_ref: (In, H)        W_ih^T
    whh_t_ref: (H, H)         W_hh^T
    b_ref:     (1, H)         b_ih + b_hh
    y_ref:     (T*B_pad, H)   all hidden states, written back to HBM once
    """
    # Hoist the input projection out of the serial chain: one batched MXU
    # matmul over all T*B_pad rows, plus the combined bias.
    u = (
        jnp.dot(x_ref[...], wih_t_ref[...], preferred_element_type=jnp.float32)
        + b_ref[...]
    )
    whh_t = whh_t_ref[...]
    hidden = whh_t.shape[1]

    # Serial recurrence, fully unrolled (seq_len is a small static constant).
    h = jnp.zeros((batch_pad, hidden), jnp.float32)
    for t in range(seq_len):
        lo = t * batch_pad
        hi = lo + batch_pad
        pre = u[lo:hi, :] + jnp.dot(h, whh_t, preferred_element_type=jnp.float32)
        h = jnp.tanh(pre)
        y_ref[lo:hi, :] = h  # sublane-aligned (multiple-of-8 rows) VMEM store


def rnn_forward(x, w_ih, w_hh, b_ih, b_hh):
    """x: (T, B, In) float32. Returns (y_flat (T*B, H), h_last (B, H))."""
    T, B, In = x.shape
    H = w_ih.shape[0]

    # --- wrapper-side glue (layout only, no compute hoisted from the kernel) ---
    # Pad batch to a multiple of 8 so tiles are sublane-dense; rows are
    # independent in the recurrence, so padding is sliced off afterwards.
    B_pad = ((B + 7) // 8) * 8
    x_pad = jnp.zeros((T, B_pad, In), jnp.float32).at[:, :B, :].set(x)
    x2 = x_pad.reshape(T * B_pad, In)

    w_ih_t = jnp.asarray(w_ih.T, jnp.float32)                 # (In, H)
    w_hh_t = jnp.asarray(w_hh.T, jnp.float32)                 # (H, H)
    bias = jnp.asarray((b_ih + b_hh)[None, :], jnp.float32)   # (1, H)

    kernel = functools.partial(rnn_kernel, seq_len=T, batch_pad=B_pad)

    y_pad = pl.pallas_call(
        kernel,
        out_shape=jax.ShapeDtypeStruct((T * B_pad, H), jnp.float32),
        # Whole arrays resident in VMEM; single invocation, single writeback.
        in_specs=[pl.BlockSpec(memory_space=pltpu.MemorySpace.VMEM)] * 4,
        out_specs=pl.BlockSpec(memory_space=pltpu.MemorySpace.VMEM),
    )(x2, w_ih_t, w_hh_t, bias)

    y = y_pad.reshape(T, B_pad, H)[:, :B, :]   # drop batch padding
    y_flat = y.reshape(T * B, H)               # matches y.reshape(-1, hidden)
    h_last = y[-1]                             # matches test[-1] (1 layer)
    return y_flat, h_last


def init_params(key, input_size, hidden_size):
    """Deterministic init mirroring nn.RNN default: U(-1/sqrt(H), 1/sqrt(H))."""
    k1, k2, k3, k4 = jax.random.split(key, 4)
    bound = 1.0 / jnp.sqrt(hidden_size)
    w_ih = jax.random.uniform(k1, (hidden_size, input_size), jnp.float32, -bound, bound)
    w_hh = jax.random.uniform(k2, (hidden_size, hidden_size), jnp.float32, -bound, bound)
    b_ih = jax.random.uniform(k3, (hidden_size,), jnp.float32, -bound, bound)
    b_hh = jax.random.uniform(k4, (hidden_size,), jnp.float32, -bound, bound)
    # NOTE: the module also defines self.fc = nn.Linear(5, 5), but it is unused
    # in forward(), so it is intentionally not implemented.
    return w_ih, w_hh, b_ih, b_hh


def reference_forward(x, w_ih, w_hh, b_ih, b_hh):
    """Pure-JAX reference of the same recurrence, for a correctness check."""
    T, B, _ = x.shape
    H = w_ih.shape[0]
    h = jnp.zeros((B, H), jnp.float32)
    ys = []
    for t in range(T):
        h = jnp.tanh(x[t] @ w_ih.T + b_ih + h @ w_hh.T + b_hh)
        ys.append(h)
    y = jnp.stack(ys, axis=0)
    return y.reshape(-1, H), h


if __name__ == "__main__":
    SEQ, BATCH, INPUT, HIDDEN = 8, 2, 16, 32

    key = jax.random.PRNGKey(0)
    kx, kp = jax.random.split(key)
    x = jax.random.normal(kx, (SEQ, BATCH, INPUT), jnp.float32)
    w_ih, w_hh, b_ih, b_hh = init_params(kp, INPUT, HIDDEN)

    y_flat, h_last = rnn_forward(x, w_ih, w_hh, b_ih, b_hh)
    jax.block_until_ready((y_flat, h_last))

    y_ref, h_ref = reference_forward(x, w_ih, w_hh, b_ih, b_hh)
    assert y_flat.shape == (SEQ * BATCH, HIDDEN)
    assert h_last.shape == (BATCH, HIDDEN)
    assert jnp.allclose(y_flat, y_ref, atol=1e-5, rtol=1e-5)
    assert jnp.allclose(h_last, h_ref, atol=1e-5, rtol=1e-5)

    print("KERNEL_OK")
</pallas_src>

<mosaic_0001>
module attributes {stable_mosaic.version = 11 : i64} {
  func.func @rnn_kernel(%arg0: memref<64x16xf32, #tpu.memory_space<vmem>>, %arg1: memref<16x32xf32, #tpu.memory_space<vmem>>, %arg2: memref<32x32xf32, #tpu.memory_space<vmem>>, %arg3: memref<1x32xf32, #tpu.memory_space<vmem>>, %arg4: memref<64x32xf32, #tpu.memory_space<vmem>>) attributes {dimension_semantics = [], scalar_prefetch = 0 : i64, scratch_operands = 0 : i64, tpu.core_type = #tpu.core_type<tc>} {
    %c0 = arith.constant 0 : index
    %c0_0 = arith.constant 0 : index
    %0 = vector.load %arg0[%c0, %c0_0] : memref<64x16xf32, #tpu.memory_space<vmem>>, vector<64x16xf32>
    %c0_1 = arith.constant 0 : index
    %c0_2 = arith.constant 0 : index
    %1 = vector.load %arg1[%c0_1, %c0_2] : memref<16x32xf32, #tpu.memory_space<vmem>>, vector<16x32xf32>
    %cst = arith.constant dense<0.000000e+00> : vector<64x32xf32>
    %2 = tpu.matmul %0, %1, %cst {dimension_numbers = #tpu.dot_dimension_numbers<[1], [0], [0], [1], [0, 0, 1, 1], [], []>} : vector<64x16xf32>, vector<16x32xf32>, vector<64x32xf32> -> vector<64x32xf32>
    %c0_3 = arith.constant 0 : index
    %c0_4 = arith.constant 0 : index
    %3 = vector.load %arg3[%c0_3, %c0_4] : memref<1x32xf32, #tpu.memory_space<vmem>>, vector<1x32xf32>
    %4 = vector.broadcast %3 : vector<1x32xf32> to vector<64x32xf32>
    %5 = arith.addf %2, %4 : vector<64x32xf32>
    %c0_5 = arith.constant 0 : index
    %c0_6 = arith.constant 0 : index
    %6 = vector.load %arg2[%c0_5, %c0_6] : memref<32x32xf32, #tpu.memory_space<vmem>>, vector<32x32xf32>
    %cst_7 = arith.constant 0.000000e+00 : f32
    %7 = vector.broadcast %cst_7 : f32 to vector<8x32xf32>
    %8 = vector.extract_strided_slice %5 {offsets = [0, 0], sizes = [8, 32], strides = [1, 1]} : vector<64x32xf32> to vector<8x32xf32>
    %cst_8 = arith.constant dense<0.000000e+00> : vector<8x32xf32>
    %9 = tpu.matmul %7, %6, %cst_8 {dimension_numbers = #tpu.dot_dimension_numbers<[1], [0], [0], [1], [0, 0, 1, 1], [], []>} : vector<8x32xf32>, vector<32x32xf32>, vector<8x32xf32> -> vector<8x32xf32>
    %10 = arith.addf %8, %9 : vector<8x32xf32>
    %11 = math.tanh %10 : vector<8x32xf32>
    %c0_9 = arith.constant 0 : index
    %c0_10 = arith.constant 0 : index
    %12 = vector.load %arg4[%c0_9, %c0_10] : memref<64x32xf32, #tpu.memory_space<vmem>>, vector<8x32xf32>
    tpu.vector_store %arg4[%c0_9, %c0_10], %11 {strides = array<i32>} : memref<64x32xf32, #tpu.memory_space<vmem>>, vector<8x32xf32>,
    %13 = vector.extract_strided_slice %5 {offsets = [8, 0], sizes = [8, 32], strides = [1, 1]} : vector<64x32xf32> to vector<8x32xf32>
    %cst_11 = arith.constant dense<0.000000e+00> : vector<8x32xf32>
    %14 = tpu.matmul %11, %6, %cst_11 {dimension_numbers = #tpu.dot_dimension_numbers<[1], [0], [0], [1], [0, 0, 1, 1], [], []>} : vector<8x32xf32>, vector<32x32xf32>, vector<8x32xf32> -> vector<8x32xf32>
    %15 = arith.addf %13, %14 : vector<8x32xf32>
    %16 = math.tanh %15 : vector<8x32xf32>
    %c8 = arith.constant 8 : index
    %c0_12 = arith.constant 0 : index
    %17 = vector.load %arg4[%c8, %c0_12] : memref<64x32xf32, #tpu.memory_space<vmem>>, vector<8x32xf32>
    tpu.vector_store %arg4[%c8, %c0_12], %16 {strides = array<i32>} : memref<64x32xf32, #tpu.memory_space<vmem>>, vector<8x32xf32>,
    %18 = vector.extract_strided_slice %5 {offsets = [16, 0], sizes = [8, 32], strides = [1, 1]} : vector<64x32xf32> to vector<8x32xf32>
    %cst_13 = arith.constant dense<0.000000e+00> : vector<8x32xf32>
    %19 = tpu.matmul %16, %6, %cst_13 {dimension_numbers = #tpu.dot_dimension_numbers<[1], [0], [0], [1], [0, 0, 1, 1], [], []>} : vector<8x32xf32>, vector<32x32xf32>, vector<8x32xf32> -> vector<8x32xf32>
    %20 = arith.addf %18, %19 : vector<8x32xf32>
    %21 = math.tanh %20 : vector<8x32xf32>
    %c16 = arith.constant 16 : index
    %c0_14 = arith.constant 0 : index
    %22 = vector.load %arg4[%c16, %c0_14] : memref<64x32xf32, #tpu.memory_space<vmem>>, vector<8x32xf32>
    tpu.vector_store %arg4[%c16, %c0_14], %21 {strides = array<i32>} : memref<64x32xf32, #tpu.memory_space<vmem>>, vector<8x32xf32>,
    %23 = vector.extract_strided_slice %5 {offsets = [24, 0], sizes = [8, 32], strides = [1, 1]} : vector<64x32xf32> to vector<8x32xf32>
    %cst_15 = arith.constant dense<0.000000e+00> : vector<8x32xf32>
    %24 = tpu.matmul %21, %6, %cst_15 {dimension_numbers = #tpu.dot_dimension_numbers<[1], [0], [0], [1], [0, 0, 1, 1], [], []>} : vector<8x32xf32>, vector<32x32xf32>, vector<8x32xf32> -> vector<8x32xf32>
    %25 = arith.addf %23, %24 : vector<8x32xf32>
    %26 = math.tanh %25 : vector<8x32xf32>
    %c24 = arith.constant 24 : index
    %c0_16 = arith.constant 0 : index
    %27 = vector.load %arg4[%c24, %c0_16] : memref<64x32xf32, #tpu.memory_space<vmem>>, vector<8x32xf32>
    tpu.vector_store %arg4[%c24, %c0_16], %26 {strides = array<i32>} : memref<64x32xf32, #tpu.memory_space<vmem>>, vector<8x32xf32>,
    %28 = vector.extract_strided_slice %5 {offsets = [32, 0], sizes = [8, 32], strides = [1, 1]} : vector<64x32xf32> to vector<8x32xf32>
    %cst_17 = arith.constant dense<0.000000e+00> : vector<8x32xf32>
    %29 = tpu.matmul %26, %6, %cst_17 {dimension_numbers = #tpu.dot_dimension_numbers<[1], [0], [0], [1], [0, 0, 1, 1], [], []>} : vector<8x32xf32>, vector<32x32xf32>, vector<8x32xf32> -> vector<8x32xf32>
    %30 = arith.addf %28, %29 : vector<8x32xf32>
    %31 = math.tanh %30 : vector<8x32xf32>
    %c32 = arith.constant 32 : index
    %c0_18 = arith.constant 0 : index
    %32 = vector.load %arg4[%c32, %c0_18] : memref<64x32xf32, #tpu.memory_space<vmem>>, vector<8x32xf32>
    tpu.vector_store %arg4[%c32, %c0_18], %31 {strides = array<i32>} : memref<64x32xf32, #tpu.memory_space<vmem>>, vector<8x32xf32>,
    %33 = vector.extract_strided_slice %5 {offsets = [40, 0], sizes = [8, 32], strides = [1, 1]} : vector<64x32xf32> to vector<8x32xf32>
    %cst_19 = arith.constant dense<0.000000e+00> : vector<8x32xf32>
    %34 = tpu.matmul %31, %6, %cst_19 {dimension_numbers = #tpu.dot_dimension_numbers<[1], [0], [0], [1], [0, 0, 1, 1], [], []>} : vector<8x32xf32>, vector<32x32xf32>, vector<8x32xf32> -> vector<8x32xf32>
    %35 = arith.addf %33, %34 : vector<8x32xf32>
    %36 = math.tanh %35 : vector<8x32xf32>
    %c40 = arith.constant 40 : index
    %c0_20 = arith.constant 0 : index
    %37 = vector.load %arg4[%c40, %c0_20] : memref<64x32xf32, #tpu.memory_space<vmem>>, vector<8x32xf32>
    tpu.vector_store %arg4[%c40, %c0_20], %36 {strides = array<i32>} : memref<64x32xf32, #tpu.memory_space<vmem>>, vector<8x32xf32>,
    %38 = vector.extract_strided_slice %5 {offsets = [48, 0], sizes = [8, 32], strides = [1, 1]} : vector<64x32xf32> to vector<8x32xf32>
    %cst_21 = arith.constant dense<0.000000e+00> : vector<8x32xf32>
    %39 = tpu.matmul %36, %6, %cst_21 {dimension_numbers = #tpu.dot_dimension_numbers<[1], [0], [0], [1], [0, 0, 1, 1], [], []>} : vector<8x32xf32>, vector<32x32xf32>, vector<8x32xf32> -> vector<8x32xf32>
    %40 = arith.addf %38, %39 : vector<8x32xf32>
    %41 = math.tanh %40 : vector<8x32xf32>
    %c48 = arith.constant 48 : index
    %c0_22 = arith.constant 0 : index
    %42 = vector.load %arg4[%c48, %c0_22] : memref<64x32xf32, #tpu.memory_space<vmem>>, vector<8x32xf32>
    tpu.vector_store %arg4[%c48, %c0_22], %41 {strides = array<i32>} : memref<64x32xf32, #tpu.memory_space<vmem>>, vector<8x32xf32>,
    %43 = vector.extract_strided_slice %5 {offsets = [56, 0], sizes = [8, 32], strides = [1, 1]} : vector<64x32xf32> to vector<8x32xf32>
    %cst_23 = arith.constant dense<0.000000e+00> : vector<8x32xf32>
    %44 = tpu.matmul %41, %6, %cst_23 {dimension_numbers = #tpu.dot_dimension_numbers<[1], [0], [0], [1], [0, 0, 1, 1], [], []>} : vector<8x32xf32>, vector<32x32xf32>, vector<8x32xf32> -> vector<8x32xf32>
    %45 = arith.addf %43, %44 : vector<8x32xf32>
    %46 = math.tanh %45 : vector<8x32xf32>
    %c56 = arith.constant 56 : index
    %c0_24 = arith.constant 0 : index
    %47 = vector.load %arg4[%c56, %c0_24] : memref<64x32xf32, #tpu.memory_space<vmem>>, vector<8x32xf32>
    tpu.vector_store %arg4[%c56, %c0_24], %46 {strides = array<i32>} : memref<64x32xf32, #tpu.memory_space<vmem>>, vector<8x32xf32>,
    return
  }
}

</mosaic_0001>

<bundles_post_ra>
// kernel: tpu_custom_call.1
= control target key start
LH: loop header
LB: loop body
LE: loop exit
PB: predicated region body
PF: predicated region fallthrough
CT: control target
= control target key end

     0   :  { %v969_v0 = vmov 0.0   ;;  %vm970_vm0 = vmmov 0   ;;  %vm34_vm1 = vcmask 130048   ;;  %vm168_vm2 = vcmask 261120   ;;  %s1190_s1 = inlined_call_operand.vmem [shape: f32[16,32], index: 1, kind: input, shape index: {}]   ;;  %s1191_s2 = inlined_call_operand.vmem [shape: f32[32,32], index: 2, kind: input, shape index: {}]   ;;  %s1192_s0 = inlined_call_operand.vmem [shape: f32[64,16], index: 0, kind: input, shape index: {}]   ;;  %s1193_s3 = inlined_call_operand.vmem [shape: f32[1,32], index: 3, kind: input, shape index: {}]   ;;  %s1194_s4 = inlined_call_operand.vmem [shape: f32[64,32], index: 4, kind: output, shape index: {}]  }
   0x1   :  { %863 = vmatprep.subr.mxu1 %v969_v0  ;;  %v26_v1 = vld [vmem:[%s1190_s1 + $0x8] sm:$0xff]  ;;  %v1003_v2 = vld [vmem:[%s1191_s2 + $0x18] sm:$0xff]  ;;  %v25_v3 = vld [vmem:[%s1190_s1] sm:$0xff]  ;;  %871 = vmatprep.mubr.msk.f32.mxu1 %vm970_vm0, %v969_v0 }
   0x2   :  { %847 = vmatprep.subr.mxu0 %v26_v1  ;;  %864 = vmatpush3.msra.mxu1 %v1003_v2  ;;  %v1014_v4 = vld [vmem:[%s1191_s2 + $0x10] sm:$0xff]  ;;  %v17_v5 = vld [vmem:[%s1192_s0] sm:$0xff]  ;;  %v18_v6 = vld [vmem:[%s1192_s0 + $0x8] sm:$0xff] }
   0x3   :  { %848 = vmatpush3.msra.mxu0 %v26_v1  ;;  %865 = vmatprep.subr.mxu1 %v969_v0  ;;  %v1027_v7 = vld [vmem:[%s1191_s2 + $0x8] sm:$0xff]  ;;  %v1035_v8 = vld [vmem:[%s1191_s2] sm:$0xff]  ;;  %v19_v17 = vld [vmem:[%s1192_s0 + $0x10] sm:$0xff] }
   0x4   :  { %849 = vmatprep.subr.mxu0 %v25_v3  ;;  %866 = vmatpush3.msra.mxu1 %v1014_v4  ;;  %v1064_v10 = vld [vmem:[%s1193_s3] ss:$0 sm:$0xff]  ;;  %v20_v18 = vld [vmem:[%s1192_s0 + $0x18] sm:$0xff]  ;;  %v22_v20 = vld [vmem:[%s1192_s0 + $0x28] sm:$0xff] }
   0x5   :  { %850 = vmatpush3.msra.mxu0 %v25_v3  ;;  %851 = vmatprep.mubr.msk.f32.mxu0 %vm34_vm1, %v17_v5  ;;  %v21_v19 = vld [vmem:[%s1192_s0 + $0x20] sm:$0xff]  ;;  %v23_v21 = vld [vmem:[%s1192_s0 + $0x30] sm:$0xff]  ;;  %v24_v22 = vld [vmem:[%s1192_s0 + $0x38] sm:$0xff] }
   0x6   :  { %867 = vmatprep.subr.mxu1 %v969_v0  ;;  %852 = vmatmul.mubr.msk.f32.vlgmr.msra.gmra.mxu0 %vm34_vm1, %v18_v6 }
   0x7   :  { %868 = vmatpush3.msra.mxu1 %v1027_v7  ;;  %885 = vmatprep.subr.mxu0 %v969_v0 }
   0x8   :  { %869 = vmatprep.subr.mxu1 %v969_v0  ;;  %886 = vmatpush3.msra.mxu0 %v1003_v2 }
   0x9   :  { %870 = vmatpush3.msra.mxu1 %v1035_v8  ;;  %887 = vmatprep.subr.mxu0 %v969_v0 }
   0xa   :  { %872 = vmatmul.mubr.f32.vlgmr.msra.gmra.mxu1 %v969_v0  ;;  %874 = vmatprep.subr.mxu1 %v969_v0 }
   0xb   :  { %875 = vmatpush3.msra.mxu1 %v1003_v2  ;;  %882 = vmatprep.mubr.msk.f32.mxu1 %vm970_vm0, %v969_v0 }
   0xc   :  { %876 = vmatprep.subr.mxu1 %v969_v0  ;;  %888 = vmatpush3.msra.mxu0 %v1014_v4 }
   0xd   :  { %877 = vmatpush3.msra.mxu1 %v1014_v4  ;;  %889 = vmatprep.subr.mxu0 %v969_v0 }
   0xe   :  { %878 = vmatprep.subr.mxu1 %v969_v0  ;;  %890 = vmatpush3.msra.mxu0 %v1027_v7 }
   0xf   :  { %879 = vmatpush3.msra.mxu1 %v1027_v7  ;;  %891 = vmatprep.subr.mxu0 %v969_v0 }
  0x10   :  { %880 = vmatprep.subr.mxu1 %v969_v0  ;;  %892 = vmatpush3.msra.mxu0 %v1035_v8 }
  0x11   :  { %881 = vmatpush3.msra.mxu1 %v1035_v8  ;;  %907 = vmatprep.subr.mxu0 %v969_v0 }
  0x12   :  { %896 = vmatprep.subr.mxu1 %v969_v0  ;;  %854 = vmatprep.mubr.msk.f32.mxu0 %vm34_vm1, %v19_v17 }
  0x13   :  { %855 = vmatmul.mubr.msk.f32.gmra.mxu0 %vm34_vm1, %v20_v18 }
  0x14   :  { %857 = vmatprep.mubr.msk.f32.mxu0 %vm34_vm1, %v21_v19 }
  0x17   :  { %858 = vmatmul.mubr.msk.f32.gmra.mxu0 %vm34_vm1, %v22_v20 }
  0x18   :  { %860 = vmatprep.mubr.msk.f32.mxu0 %vm34_vm1, %v23_v21 }
  0x1b   :  { %861 = vmatmul.mubr.msk.f32.gmra.mxu0 %vm34_vm1, %v24_v22 }
  0x1c   :  { %893 = vmatprep.mubr.msk.f32.mxu0 %vm970_vm0, %v969_v0 }
  0xc6   :  { %v853_v9 = vpop.f32.mrf.mxu0 }
  0xc7   :  { %v131_v23 = vadd.f32 %v853_v9, %v1064_v10 }
  0xc8   :  { %v125_v11 = vpop.f32.mrf.mxu0 }
  0xc9   :  { %v126_v12 = vadd.f32 %v1064_v10, %v125_v11 }
  0xca   :  { %v238_v13 = vpop.f32.mrf.mxu1 }
  0xcb   :  { %v242_v14 = vadd.f32 %v238_v13, %v126_v12 }
  0xcc   :  { %v873_v15 = vpop.f32.mrf.mxu1 }
  0xcd   :  { %953 = vtanh.f32 %v242_v14 }
  0xd3   :  { %v856_v28 = vpop.f32.mrf.mxu0 }
  0xd4   :  { %v141_v39 = vadd.f32 %v856_v28, %v1064_v10 }
  0xd5   :  { %v135_v29 = vpop.f32.mrf.mxu0 }
  0xd6   :  { %v136_v34 = vadd.f32 %v1064_v10, %v135_v29 }
  0xd7   :  { %v859_v30 = vpop.f32.mrf.mxu0 }
  0xd8   :  { %v151_v49 = vadd.f32 %v859_v30, %v1064_v10 }
  0xd9   :  { %v145_v31 = vpop.f32.mrf.mxu0 }
  0xda   :  { %v954_v16 = vpop.eup %953  ;;  %v146_v44 = vadd.f32 %v1064_v10, %v145_v31 }
  0xdb   :  { %244 = vst.msk [vmem:[%s1194_s4] sm:$0xff] %vm168_vm2, %v954_v16  ;;  %883 = vmatmul.mubr.msk.f32.vlgmr.msra.gmra.mxu1 %vm168_vm2, %v954_v16  ;;  %v1124_v32 = vpop.f32.mrf.mxu0 }
  0xdc   :  { %897 = vmatpush3.msra.mxu1 %v1003_v2  ;;  %904 = vmatprep.mubr.msk.f32.mxu1 %vm970_vm0, %v969_v0  ;;  %v161_v59 = vadd.f32 %v1124_v32, %v1064_v10 }
  0xdd   :  { %898 = vmatprep.subr.mxu1 %v969_v0  ;;  %v155_v33 = vpop.f32.mrf.mxu0 }
  0xde   :  { %899 = vmatpush3.msra.mxu1 %v1014_v4  ;;  %v156_v54 = vadd.f32 %v1064_v10, %v155_v33 }
  0xdf   :  { %900 = vmatprep.subr.mxu1 %v969_v0 }
  0xe0   :  { %901 = vmatpush3.msra.mxu1 %v1027_v7 }
  0xe1   :  { %902 = vmatprep.subr.mxu1 %v969_v0 }
  0xe2   :  { %903 = vmatpush3.msra.mxu1 %v1035_v8 }
  0xe3   :  { %918 = vmatprep.subr.mxu1 %v969_v0 }
 0x19b   :  { %v314_v24 = vpop.f32.mrf.mxu1 }
 0x19c   :  { %v318_v25 = vadd.f32 %v314_v24, %v131_v23 }
 0x19d   :  { %v884_v26 = vpop.f32.mrf.mxu1 }
 0x19e   :  { %955 = vtanh.f32 %v318_v25 }
 0x1ab   :  { %v956_v27 = vpop.eup %955 }
 0x1ac   :  { %320 = vst.msk [vmem:[%s1194_s4 + $0x8] sm:$0xff] %vm168_vm2, %v956_v27  ;;  %894 = vmatmul.mubr.msk.f32.vlgmr.msra.gmra.mxu0 %vm168_vm2, %v956_v27 }
 0x1ad   :  { %908 = vmatpush3.msra.mxu0 %v1003_v2  ;;  %915 = vmatprep.mubr.msk.f32.mxu0 %vm970_vm0, %v969_v0 }
 0x1ae   :  { %909 = vmatprep.subr.mxu0 %v969_v0 }
 0x1af   :  { %910 = vmatpush3.msra.mxu0 %v1014_v4 }
 0x1b0   :  { %911 = vmatprep.subr.mxu0 %v969_v0 }
 0x1b1   :  { %912 = vmatpush3.msra.mxu0 %v1027_v7 }
 0x1b2   :  { %913 = vmatprep.subr.mxu0 %v969_v0 }
 0x1b3   :  { %914 = vmatpush3.msra.mxu0 %v1035_v8 }
 0x1b4   :  { %929 = vmatprep.subr.mxu0 %v969_v0 }
 0x26c   :  { %v390_v35 = vpop.f32.mrf.mxu0 }
 0x26d   :  { %v394_v36 = vadd.f32 %v390_v35, %v136_v34 }
 0x26e   :  { %v895_v37 = vpop.f32.mrf.mxu0 }
 0x26f   :  { %957 = vtanh.f32 %v394_v36 }
 0x27c   :  { %v958_v38 = vpop.eup %957 }
 0x27d   :  { %396 = vst.msk [vmem:[%s1194_s4 + $0x10] sm:$0xff] %vm168_vm2, %v958_v38  ;;  %905 = vmatmul.mubr.msk.f32.vlgmr.msra.gmra.mxu1 %vm168_vm2, %v958_v38 }
 0x27e   :  { %919 = vmatpush3.msra.mxu1 %v1003_v2  ;;  %926 = vmatprep.mubr.msk.f32.mxu1 %vm970_vm0, %v969_v0 }
 0x27f   :  { %920 = vmatprep.subr.mxu1 %v969_v0 }
 0x280   :  { %921 = vmatpush3.msra.mxu1 %v1014_v4 }
 0x281   :  { %922 = vmatprep.subr.mxu1 %v969_v0 }
 0x282   :  { %923 = vmatpush3.msra.mxu1 %v1027_v7 }
 0x283   :  { %924 = vmatprep.subr.mxu1 %v969_v0 }
 0x284   :  { %925 = vmatpush3.msra.mxu1 %v1035_v8 }
 0x285   :  { %940 = vmatprep.subr.mxu1 %v969_v0 }
 0x33d   :  { %v466_v40 = vpop.f32.mrf.mxu1 }
 0x33e   :  { %v470_v41 = vadd.f32 %v466_v40, %v141_v39 }
 0x33f   :  { %v906_v42 = vpop.f32.mrf.mxu1 }
 0x340   :  { %959 = vtanh.f32 %v470_v41 }
 0x34d   :  { %v960_v43 = vpop.eup %959 }
 0x34e   :  { %472 = vst.msk [vmem:[%s1194_s4 + $0x18] sm:$0xff] %vm168_vm2, %v960_v43  ;;  %916 = vmatmul.mubr.msk.f32.vlgmr.msra.gmra.mxu0 %vm168_vm2, %v960_v43 }
 0x34f   :  { %930 = vmatpush3.msra.mxu0 %v1003_v2  ;;  %937 = vmatprep.mubr.msk.f32.mxu0 %vm970_vm0, %v969_v0 }
 0x350   :  { %931 = vmatprep.subr.mxu0 %v969_v0 }
 0x351   :  { %932 = vmatpush3.msra.mxu0 %v1014_v4 }
 0x352   :  { %933 = vmatprep.subr.mxu0 %v969_v0 }
 0x353   :  { %934 = vmatpush3.msra.mxu0 %v1027_v7 }
 0x354   :  { %935 = vmatprep.subr.mxu0 %v969_v0 }
 0x355   :  { %936 = vmatpush3.msra.mxu0 %v1035_v8 }
 0x40e   :  { %v542_v45 = vpop.f32.mrf.mxu0 }
 0x40f   :  { %v546_v46 = vadd.f32 %v542_v45, %v146_v44 }
 0x410   :  { %v917_v47 = vpop.f32.mrf.mxu0 }
 0x411   :  { %961 = vtanh.f32 %v546_v46 }
 0x41e   :  { %v962_v48 = vpop.eup %961 }
 0x41f   :  { %548 = vst.msk [vmem:[%s1194_s4 + $0x20] sm:$0xff] %vm168_vm2, %v962_v48  ;;  %927 = vmatmul.mubr.msk.f32.vlgmr.msra.gmra.mxu1 %vm168_vm2, %v962_v48 }
 0x420   :  { %941 = vmatpush3.msra.mxu1 %v1003_v2  ;;  %948 = vmatprep.mubr.msk.f32.mxu1 %vm970_vm0, %v969_v0 }
 0x421   :  { %942 = vmatprep.subr.mxu1 %v969_v0 }
 0x422   :  { %943 = vmatpush3.msra.mxu1 %v1014_v4 }
 0x423   :  { %944 = vmatprep.subr.mxu1 %v969_v0 }
 0x424   :  { %945 = vmatpush3.msra.mxu1 %v1027_v7 }
 0x425   :  { %946 = vmatprep.subr.mxu1 %v969_v0 }
 0x426   :  { %947 = vmatpush3.msra.mxu1 %v1035_v8 }
 0x4df   :  { %v618_v50 = vpop.f32.mrf.mxu1 }
 0x4e0   :  { %v622_v51 = vadd.f32 %v618_v50, %v151_v49 }
 0x4e1   :  { %v928_v52 = vpop.f32.mrf.mxu1 }
 0x4e2   :  { %963 = vtanh.f32 %v622_v51 }
 0x4ef   :  { %v964_v53 = vpop.eup %963 }
 0x4f0   :  { %624 = vst.msk [vmem:[%s1194_s4 + $0x28] sm:$0xff] %vm168_vm2, %v964_v53  ;;  %938 = vmatmul.mubr.msk.f32.vlgmr.msra.gmra.mxu0 %vm168_vm2, %v964_v53 }
 0x5b0   :  { %v694_v55 = vpop.f32.mrf.mxu0 }
 0x5b1   :  { %v698_v56 = vadd.f32 %v694_v55, %v156_v54 }
 0x5b2   :  { %v939_v57 = vpop.f32.mrf.mxu0 }
 0x5b3   :  { %965 = vtanh.f32 %v698_v56 }
 0x5c0   :  { %v966_v58 = vpop.eup %965 }
 0x5c1   :  { %700 = vst.msk [vmem:[%s1194_s4 + $0x30] sm:$0xff] %vm168_vm2, %v966_v58  ;;  %949 = vmatmul.mubr.msk.f32.vlgmr.msra.gmra.mxu1 %vm168_vm2, %v966_v58 }
 0x681   :  { %v770_v60 = vpop.f32.mrf.mxu1 }
 0x682   :  { %v774_v61 = vadd.f32 %v770_v60, %v161_v59 }
 0x683   :  { %v950_v62 = vpop.f32.mrf.mxu1 }
 0x684   :  { %967 = vtanh.f32 %v774_v61 }
 0x691   :  { %v968_v63 = vpop.eup %967 }
 0x692   :  { %776 = vst.msk [vmem:[%s1194_s4 + $0x38] sm:$0xff] %vm168_vm2, %v968_v63 }

</bundles_post_ra>
